<compile_context>
chip_gen: v7x
topology: tpu7x:2x2x1
jax: 0.10.0
libtpu: 0.0.40
codegen_flags: <defaults>
</compile_context>

<pallas_src>
import math

import jax
import jax.numpy as jnp
from jax import lax
from jax.experimental import pallas as pl
from jax.experimental.pallas import tpu as pltpu

# ----- "cfg" constants (synthetic, small) -----
B = 2          # batch
T = 8          # sequence length (dim the tokens live on)
D_IN = 16      # t_1.shape[2]  (input feature dim of the projection)
F_OUT = 32     # cfg.features  (== t_0 feature dim)


# ----------------------------------------------------------------------------
# Fused kernel: out = t_0 + t_1 @ W^T + b      (single MXU pass + VPU adds)
# ----------------------------------------------------------------------------
def _token_add_kernel(t0_ref, t1_ref, w_ref, b_ref, o_ref):
    # t0_ref: (TM, F_OUT)   t1_ref: (TM, D_IN)
    # w_ref : (F_OUT, D_IN) b_ref : (1, F_OUT)
    x = t1_ref[...]
    w = w_ref[...]
    # x @ W^T without materialising a transpose: contract x axis 1 with w axis 1
    proj = lax.dot_general(x, w, (((1,), (1,)), ((), ())),
                           preferred_element_type=jnp.float32)
    o_ref[...] = (t0_ref[...] + proj + b_ref[...]).astype(o_ref.dtype)


def token_add(t0, t1, weight, bias, *, row_tile=128):
    """t0: (B, T, F_OUT); t1: (B, T, D_IN); weight: (F_OUT, D_IN); bias: (F_OUT,)."""
    Bn, Tn, Fo = t0.shape
    Din = t1.shape[2]

    # Fold the batch into the sublane (row) axis: one tile covers the whole
    # demo-sized problem, so there is a single grid step and zero re-staging.
    R = Bn * Tn
    t0_2d = t0.reshape(R, Fo)
    t1_2d = t1.reshape(R, Din)

    tm = min(row_tile, R)
    n_tiles = pl.cdiv(R, tm)
    Rp = n_tiles * tm
    if Rp != R:  # pad rows so every tile is full (keeps the (8,128) block rule)
        t0_2d = jnp.pad(t0_2d, ((0, Rp - R), (0, 0)))
        t1_2d = jnp.pad(t1_2d, ((0, Rp - R), (0, 0)))

    out = pl.pallas_call(
        _token_add_kernel,
        out_shape=jax.ShapeDtypeStruct((Rp, Fo), jnp.float32),
        grid=(n_tiles,),
        in_specs=[
            pl.BlockSpec((tm, Fo), lambda i: (i, 0)),     # t_0 rows
            pl.BlockSpec((tm, Din), lambda i: (i, 0)),    # t_1 rows
            pl.BlockSpec((Fo, Din), lambda i: (0, 0)),    # weight (resident)
            pl.BlockSpec((1, Fo), lambda i: (0, 0)),      # bias   (resident)
        ],
        out_specs=pl.BlockSpec((tm, Fo), lambda i: (i, 0)),
        compiler_params=pltpu.CompilerParams(
            dimension_semantics=("parallel",)),           # v7x: shard across TCs
    )(t0_2d, t1_2d, weight, bias.reshape(1, Fo))

    return out[:R].reshape(Bn, Tn, Fo)


# ----------------------------------------------------------------------------
if __name__ == "__main__":
    key = jax.random.PRNGKey(0)
    k0, k1, kw, kb = jax.random.split(key, 4)

    t0 = jax.random.normal(k0, (B, T, F_OUT), dtype=jnp.float32)
    t1 = jax.random.normal(k1, (B, T, D_IN), dtype=jnp.float32)

    # nn.Linear(D_IN, F_OUT) parameters (PyTorch default init range), fixed.
    bound = 1.0 / math.sqrt(D_IN)
    weight = jax.random.uniform(kw, (F_OUT, D_IN),
                                minval=-bound, maxval=bound).astype(jnp.float32)
    bias = jax.random.uniform(kb, (F_OUT,),
                              minval=-bound, maxval=bound).astype(jnp.float32)

    fwd = jax.jit(token_add)
    out = fwd(t0, t1, weight, bias)
    jax.block_until_ready(out)

    # pure-JAX reference: t_0 + Linear(t_1)
    ref = t0 + (t1 @ weight.T + bias)
    assert out.shape == (B, T, F_OUT)
    assert jnp.allclose(out, ref, atol=1e-5, rtol=1e-5), \
        f"mismatch, max diff {jnp.max(jnp.abs(out - ref))}"

    print("KERNEL_OK")
</pallas_src>

<mosaic_0001>
module attributes {stable_mosaic.version = 11 : i64} {
  func.func @_token_add_kernel(%arg0: i32, %arg1: memref<16x32xf32, #tpu.memory_space<vmem>>, %arg2: memref<16x16xf32, #tpu.memory_space<vmem>>, %arg3: memref<32x16xf32, #tpu.memory_space<vmem>>, %arg4: memref<1x32xf32, #tpu.memory_space<vmem>>, %arg5: memref<16x32xf32, #tpu.memory_space<vmem>>) attributes {dimension_semantics = [#tpu.dimension_semantics<parallel>], iteration_bounds = array<i64: 1>, scalar_prefetch = 0 : i64, scratch_operands = 0 : i64, tpu.core_type = #tpu.core_type<tc>, window_params = [{transform_indices = @transform_0, window_bounds = array<i64: 16, 32>}, {transform_indices = @transform_1, window_bounds = array<i64: 16, 16>}, {pipeline_mode = #tpu.pipeline_mode<synchronous>, transform_indices = @transform_2, window_bounds = array<i64: 32, 16>}, {pipeline_mode = #tpu.pipeline_mode<synchronous>, transform_indices = @transform_3, window_bounds = array<i64: 1, 32>}, {transform_indices = @transform_4, window_bounds = array<i64: 16, 32>}]} {
    %c0 = arith.constant 0 : index
    %c0_0 = arith.constant 0 : index
    %0 = vector.load %arg2[%c0, %c0_0] : memref<16x16xf32, #tpu.memory_space<vmem>>, vector<16x16xf32>
    %c0_1 = arith.constant 0 : index
    %c0_2 = arith.constant 0 : index
    %1 = vector.load %arg3[%c0_1, %c0_2] : memref<32x16xf32, #tpu.memory_space<vmem>>, vector<32x16xf32>
    %cst = arith.constant dense<0.000000e+00> : vector<16x32xf32>
    %2 = tpu.matmul %0, %1, %cst {dimension_numbers = #tpu.dot_dimension_numbers<[1], [1], [0], [0], [0, 0, 1, 0], [], []>} : vector<16x16xf32>, vector<32x16xf32>, vector<16x32xf32> -> vector<16x32xf32>
    %c0_3 = arith.constant 0 : index
    %c0_4 = arith.constant 0 : index
    %3 = vector.load %arg1[%c0_3, %c0_4] : memref<16x32xf32, #tpu.memory_space<vmem>>, vector<16x32xf32>
    %4 = arith.addf %3, %2 : vector<16x32xf32>
    %c0_5 = arith.constant 0 : index
    %c0_6 = arith.constant 0 : index
    %5 = vector.load %arg4[%c0_5, %c0_6] : memref<1x32xf32, #tpu.memory_space<vmem>>, vector<1x32xf32>
    %6 = vector.broadcast %5 : vector<1x32xf32> to vector<16x32xf32>
    %7 = arith.addf %4, %6 : vector<16x32xf32>
    %c0_7 = arith.constant 0 : index
    %c0_8 = arith.constant 0 : index
    %8 = vector.load %arg5[%c0_7, %c0_8] : memref<16x32xf32, #tpu.memory_space<vmem>>, vector<16x32xf32>
    tpu.vector_store %arg5[%c0_7, %c0_8], %7 {strides = array<i32>} : memref<16x32xf32, #tpu.memory_space<vmem>>, vector<16x32xf32>,
    return
  }
  func.func @transform_0(%arg0: i32) -> (i32, i32) {
    %c0_i32 = arith.constant 0 : i32
    %c0_i32_0 = arith.constant 0 : i32
    return %arg0, %c0_i32 : i32, i32
  }
  func.func @transform_1(%arg0: i32) -> (i32, i32) {
    %c0_i32 = arith.constant 0 : i32
    %c0_i32_0 = arith.constant 0 : i32
    return %arg0, %c0_i32 : i32, i32
  }
  func.func @transform_2(%arg0: i32) -> (i32, i32) {
    %c0_i32 = arith.constant 0 : i32
    %c0_i32_0 = arith.constant 0 : i32
    %c0_i32_1 = arith.constant 0 : i32
    return %c0_i32, %c0_i32_0 : i32, i32
  }
  func.func @transform_3(%arg0: i32) -> (i32, i32) {
    %c0_i32 = arith.constant 0 : i32
    %c0_i32_0 = arith.constant 0 : i32
    %c0_i32_1 = arith.constant 0 : i32
    return %c0_i32, %c0_i32_0 : i32, i32
  }
  func.func @transform_4(%arg0: i32) -> (i32, i32) {
    %c0_i32 = arith.constant 0 : i32
    %c0_i32_0 = arith.constant 0 : i32
    return %arg0, %c0_i32 : i32, i32
  }
}

</mosaic_0001>

<bundles_post_ra>
// kernel: token_add.1
= control target key start
LH: loop header
LB: loop body
LE: loop exit
PB: predicated region body
PF: predicated region fallthrough
CT: control target
= control target key end

     0   :  { %vm24_vm0 = vcmask 130048   ;;  %s280_s0 = inlined_call_operand.vmem [shape: f32[16,32], index: 0, kind: input, shape index: {}]   ;;  %s281_s1 = inlined_call_operand.vmem [shape: f32[16,16], index: 1, kind: input, shape index: {}]   ;;  %s282_s2 = inlined_call_operand.vmem [shape: f32[32,16], index: 2, kind: input, shape index: {}]   ;;  %s283_s3 = inlined_call_operand.vmem [shape: f32[1,32], index: 3, kind: input, shape index: {}]   ;;  %s284_s4 = inlined_call_operand.hbm [shape: f32[16,32], index: 4, kind: output, shape index: {}]  }
   0x1   :  { %v20_v0 = vld [vmem:[%s282_s2] sm:$0xff]  ;;  %v21_v1 = vld [vmem:[%s282_s2 + $0x8] sm:$0xff]  ;;  %v22_v2 = vld [vmem:[%s282_s2 + $0x10] sm:$0xff] }
   0x2   :  { %v174_v3 = vpack.c.bf16 %v21_v1, %v20_v0  ;;  %vm175_vm1 = vmpackc.low %vm24_vm0, %vm24_vm0  ;;  %v23_v4 = vld [vmem:[%s282_s2 + $0x18] sm:$0xff]  ;;  %v18_v5 = vld [vmem:[%s281_s1] sm:$0xff] }
   0x3   :  { %v180_v6 = vpack.c.bf16 %v23_v4, %v22_v2  ;;  %171 = vmatprep.mubr.msk.f32.mxu0 %vm24_vm0, %v18_v5 }
   0x4   :  { %9 = vsyncpa [#allocation3], 0  ;;  %176 = vmatprep.subr.msk.bf16.mxu0 %vm175_vm1, %v174_v3  ;;  %v19_v7 = vld [vmem:[%s281_s1 + $0x8] sm:$0xff]  ;;  %v118_v9 = vld [vmem:[%s280_s0] sm:$0xff]  ;;  %s213_s6 = smov [#allocation2]   ;;  %vm131_vm2 = vcmask 261120  }
   0x5   :  { %179 = vmatpush3.bf16.xpose.msk.msra.mxu0 %vm175_vm1, %v174_v3  ;;  %v119_v8 = vld [vmem:[%s280_s0 + $0x8] sm:$0xff]  ;;  %v156_v11 = vld [vmem:[%s283_s3] ss:$0 sm:$0xff]  ;;  %s139_s7 = sshll.u32 %s213_s6, 4  ;;  %s140_s7 = int_to_ptr.vmem [resolvable:$true] %s139_s7 }
   0x6   :  { %182 = vmatprep.subr.msk.bf16.mxu0 %vm175_vm1, %v180_v6  ;;  %s189_s1 = scalar_lea.vmem %s140_s7, 256  ;;  %p194_p1 = scmp.lt.s32.totalorder %s140_s7, %s140_s7 }
   0x7   :  { %p190_p0 = scmp.ne.s32.totalorder %s140_s7, %s189_s1  ;;  %p195_p2 = scmp.lt.s32.totalorder %s189_s1, %s189_s1 }
   0x9   :  { %p196_p3 = por %p195_p2, %p194_p1 }
   0xb   :  { %p197_p4 = pnand %p196_p3, %p190_p0 }
   0xd   :  { %185 = vmatpush3.bf16.xpose.msk.msra.mxu0 %vm175_vm1, %v180_v6 }
  0x14   :  { %172 = vmatmul.mubr.msk.f32.vlgmr.msra.gmra.mrb[0].mxu0 %vm24_vm0, %v19_v7 }
  0xe7   :  { %v173_v10 = vpop.f32.mrb[0].mxu0 }
  0xe8   :  { %v121_v12 = vadd.f32 %v173_v10, %v119_v8  ;;  %v109_v13 = vpop.f32.mrb[1].mxu0 }
  0xe9   :  { %v120_v14 = vadd.f32 %v118_v9, %v109_v13 }
  0xea   :  { %v130_v15 = vadd.f32 %v156_v11, %v121_v12 }
  0xeb   :  { %v129_v16 = vadd.f32 %v156_v11, %v120_v14 }
  0xec   :  { %133 = vst.msk [vmem:[#allocation2 + $0x8] sm:$0xff] %vm131_vm2, %v130_v15 }
  0xed   :  { %132 = vst.msk [vmem:[#allocation2] sm:$0xff] %vm131_vm2, %v129_v16 }
  0xee   :  { %200 = shalt.err (!%p197_p4)
}
  0xef   :  { %s201_s8 = scalar_lea.hbm %s284_s4, 256 }
  0xf0   :  { %p202_p5 = scmp.ne.s32.totalorder %s284_s4, %s201_s8  ;;  %p205_p6 = scmp.lt.u32.totalorder %s201_s8, %s284_s4 }
  0xf2   :  { %p207_p7 = pnand %p205_p6, %p202_p5 }
  0xf4   :  { %210 = shalt.err (!%p207_p7)
}
  0xf5   :  { %s214_s13 = smov 128   ;;  %s215_s14 = smov 8  }
  0xf6   :  { %145 = dma.vmem_to_hbm [thread:$0]  %s140_s7, 256, %s284_s4, [#allocation3], %s214_s13, %s214_s13, %s215_s14  }
  0xf7   :  { %211 = dma.done.wait [#allocation3], 256  }
  0xf8   :  { %212 = vsyncadd [#allocation3], 4294967040 }
  0xf9   :  { %149 = vsyncpa [#allocation3], 1 }

</bundles_post_ra>
